<compile_context>
chip_gen: v6e
topology: v6e:2x2x1
jax: 0.10.0
libtpu: 0.0.40
codegen_flags: <defaults>
</compile_context>

<pallas_src>
import functools

import jax
import jax.numpy as jnp
from jax.experimental import pallas as pl
from jax.experimental.pallas import tpu as pltpu

LANE = 128


def _round_up(x, m):
    return (x + m - 1) // m * m


def _pick_tile(n, cap, mult=1):
    """Largest divisor of n that is <= cap and a multiple of `mult`
    (falls back to n itself, which is always a legal full-extent block)."""
    if n <= cap:
        return n
    for t in range(cap, 0, -1):
        if n % t == 0 and t % mult == 0:
            return t
    return n


# ----------------------------------------------------------------------------
# Kernel 1: conv1 (im2col matmul, bf16 operands) + folded BN shift + ReLU.
# ----------------------------------------------------------------------------
def _conv_bn_relu_kernel(p_ref, w_ref, shift_ref, o_ref):
    # p_ref: (TILE_M, K_pad) bf16 patches; w_ref: (K_pad, COUT_PAD) bf16 with
    # the BN scale folded in; shift_ref: (1, COUT_PAD) f32.
    # MXU accumulates in f32; the epilogue (shift + ReLU) stays in f32 and the
    # activation is stored as bf16.
    y = jnp.dot(p_ref[...], w_ref[...], preferred_element_type=jnp.float32)
    o_ref[...] = jnp.maximum(y + shift_ref[...], 0.0).astype(o_ref.dtype)


def conv1_bn_relu(x_nhwc, w_oihw, gamma, beta, mean, var, eps=1e-5, tile_m=1024):
    """Returns (N, OH, OW, Cout_pad) bf16 with channels zero-padded to 128."""
    N, H, W, Cin = x_nhwc.shape
    Cout, _, KH, KW = w_oihw.shape
    stride, pad = 2, 3
    OH = (H + 2 * pad - KH) // stride + 1
    OW = (W + 2 * pad - KW) // stride + 1

    # Inference BatchNorm folded: scale into the conv weights, only the shift
    # (+ReLU) remains in the kernel epilogue.
    inv_std = 1.0 / jnp.sqrt(var + eps)
    scale = gamma * inv_std                       # (Cout,)
    shift = beta - mean * scale                   # (Cout,)

    # im2col in bf16 (half the HBM bytes vs f32 patches).
    # TODO(synk): the remaining ~12x im2col HBM blow-up should be removed by
    # building the (TILE_M, K) patch tile inside the kernel from a haloed
    # row-block of the NHWC input (manual DMA / element-offset index_map);
    # kept in HBM here for lowering robustness, but with minimal K padding.
    xp = jnp.pad(x_nhwc.astype(jnp.bfloat16),
                 ((0, 0), (pad, pad), (pad, pad), (0, 0)))
    cols = []
    for kh in range(KH):
        for kw in range(KW):
            cols.append(xp[:, kh:kh + stride * OH:stride,
                           kw:kw + stride * OW:stride, :])      # (N, OH, OW, Cin)
    patches = jnp.stack(cols, axis=3).reshape(N * OH * OW, KH * KW * Cin)

    # Weight matrix (K, Cout) with BN scale folded.
    w_mat = jnp.transpose(w_oihw, (2, 3, 1, 0)).reshape(KH * KW * Cin, Cout)
    w_mat = w_mat * scale[None, :]

    M, K = patches.shape
    # Pad K only to a multiple of 32 (keeps the bf16 RHS sublane tiling clean);
    # padding 147 -> 256 would add ~74% dead bytes on the dominant HBM stream
    # plus dead MXU contraction, so we deliberately do NOT round K up to 128.
    K_pad = _round_up(K, 32)
    Cout_pad = _round_up(Cout, LANE)

    # Big M tiles amortize the ~0.35us/step grid overhead.  At real ResNet
    # sizes use 2048-4096 on v5e/v6e and 1024-2048 on v7x (64 MiB physical
    # VMEM, inputs/outputs double-buffered); keep TILE_M a multiple of 256.
    TILE_M = min(tile_m, _round_up(M, 256))
    M_pad = _round_up(M, TILE_M)

    patches = jnp.pad(patches, ((0, M_pad - M), (0, K_pad - K)))
    w_mat = jnp.pad(w_mat, ((0, K_pad - K), (0, Cout_pad - Cout))).astype(jnp.bfloat16)
    shift_p = jnp.pad(shift, (0, Cout_pad - Cout)).reshape(1, Cout_pad).astype(jnp.float32)

    out = pl.pallas_call(
        _conv_bn_relu_kernel,
        grid=(M_pad // TILE_M,),
        in_specs=[
            pl.BlockSpec((TILE_M, K_pad), lambda i: (i, 0)),
            # Weight / shift blocks are grid-invariant (constant index_map) so
            # the pipeline never re-fetches them; their second buffer costs
            # only ~40 KiB here, which is why we leave buffering at default
            # rather than forcing single-buffering.
            pl.BlockSpec((K_pad, Cout_pad), lambda i: (0, 0)),
            pl.BlockSpec((1, Cout_pad), lambda i: (0, 0)),
        ],
        out_specs=pl.BlockSpec((TILE_M, Cout_pad), lambda i: (i, 0)),
        out_shape=jax.ShapeDtypeStruct((M_pad, Cout_pad), jnp.bfloat16),
        compiler_params=pltpu.CompilerParams(
            dimension_semantics=("parallel",),
            vmem_limit_bytes=32 * 1024 * 1024),  # raise further if tile_m is pushed to 2-4k
    )(patches, w_mat, shift_p)
    return out[:M].reshape(N, OH, OW, Cout_pad)


# ----------------------------------------------------------------------------
# Kernel 2: MaxPool2d(kernel=3, stride=2, padding=1), NHWC, separable, no
#           padded scratch, row-tiled with a 1-row halo BlockSpec.
# ----------------------------------------------------------------------------
def _maxpool_kernel(x_ref, halo_ref, o_ref, *, toh, ow):
    # Separable 3x3/s2/p1 max computed from strided ref loads -- no padded
    # VMEM scratch copy.  The "left" pad tap of the first output column and
    # the "up" pad tap of the first output row are replaced by the window's
    # own centre tap, which can never change the max -> exact for any input.
    def wpass(ref):
        c = ref[:, :, pl.ds(0, ow, stride=2), :]            # cols 2*ow
        r = ref[:, :, pl.ds(1, ow, stride=2), :]            # cols 2*ow + 1
        l = jnp.concatenate([c[:, :, :1, :], r[:, :, :ow - 1, :]], axis=2)
        return jnp.maximum(jnp.maximum(c, r), l)            # (1, rows, OW, C)

    b = wpass(x_ref)                   # W-reduced input rows 2*r0 .. 2*r0+2*TOH-1
    h = wpass(halo_ref)                # W-reduced input row  2*r0-1 (clamped)
    ch = b[:, 0::2]                    # input rows 2*oh      -> (1, TOH, OW, C)
    dn = b[:, 1::2]                    # input rows 2*oh + 1
    up = jnp.concatenate([h, dn[:, :toh - 1]], axis=1)      # input rows 2*oh - 1
    o_ref[...] = jnp.maximum(jnp.maximum(ch, dn), up)


def maxpool_3x3_s2_p1(x_nhwc):
    N, H, W, C = x_nhwc.shape
    assert H % 2 == 0 and W % 2 == 0, "maxpool kernel assumes even H, W"
    OH = (H + 2 - 3) // 2 + 1          # == H // 2
    OW = (W + 2 - 3) // 2 + 1          # == W // 2
    assert OH >= 2 and OW >= 2

    TOH = _pick_tile(OH, 16)           # output rows per grid step
    if TOH < 2:                        # degenerate (prime OH > 16): whole image
        TOH = OH
    halo_rows = 2 * TOH
    kernel = functools.partial(_maxpool_kernel, toh=TOH, ow=OW)

    return pl.pallas_call(
        kernel,
        grid=(N, OH // TOH),
        in_specs=[
            pl.BlockSpec((1, 2 * TOH, W, C), lambda n, t: (n, t, 0, 0)),
            # 1-row halo: input row 2*r0 - 1, clamped to 0 on the first tile
            # (where it merely duplicates the centre tap -> still exact).
            pl.BlockSpec((1, 1, W, C),
                         lambda n, t: (n, jnp.maximum(t * halo_rows - 1, 0), 0, 0)),
        ],
        out_specs=pl.BlockSpec((1, TOH, OW, C), lambda n, t: (n, t, 0, 0)),
        out_shape=jax.ShapeDtypeStruct((N, OH, OW, C), x_nhwc.dtype),
        compiler_params=pltpu.CompilerParams(
            dimension_semantics=("parallel", "parallel")),
    )(x_nhwc, x_nhwc)


# ----------------------------------------------------------------------------
# Kernel 3: AdaptiveAvgPool2d((1,1)) + flatten + Linear (lane-dense output),
#           gridded over batch tiles and spatial chunks with an f32 accumulator.
# ----------------------------------------------------------------------------
def _avgpool_fc_kernel(x_ref, w_ref, b_ref, o_ref, acc_ref, *, inv_hw):
    # x_ref: (TB, SC, C) bf16 chunk of the flattened activation;
    # acc_ref: (TB, C) f32 running spatial sum; last spatial step does mean+fc.
    s = pl.program_id(1)

    @pl.when(s == 0)
    def _():
        acc_ref[...] = jnp.zeros_like(acc_ref)

    acc_ref[...] += jnp.sum(x_ref[...].astype(jnp.float32), axis=1)

    @pl.when(s == pl.num_programs(1) - 1)
    def _():
        feat = acc_ref[...] * inv_hw                            # (TB, C) f32 mean
        o_ref[...] = jnp.dot(feat, w_ref[...],
                             preferred_element_type=jnp.float32) + b_ref[...]


def avgpool_fc(x_nhwc, fc_w, fc_b):
    N, H, W, C = x_nhwc.shape                 # C already padded to 128
    num_classes, c_real = fc_w.shape
    NC_pad = _round_up(num_classes, LANE)     # lane-dense output block
    HW = H * W

    TB = min(N, 8)                            # batch rows per grid step
    N_pad = _round_up(N, TB)
    SC = _pick_tile(HW, 1024, mult=8)         # spatial rows per grid step

    x_flat = jnp.pad(x_nhwc.reshape(N, HW, C), ((0, N_pad - N), (0, 0), (0, 0)))
    w_t = jnp.zeros((C, NC_pad), jnp.float32).at[:c_real, :num_classes].set(
        fc_w.T.astype(jnp.float32))
    bias = jnp.zeros((1, NC_pad), jnp.float32).at[0, :num_classes].set(
        fc_b.astype(jnp.float32))

    kernel = functools.partial(_avgpool_fc_kernel, inv_hw=1.0 / HW)
    out = pl.pallas_call(
        kernel,
        grid=(N_pad // TB, HW // SC),
        in_specs=[
            pl.BlockSpec((TB, SC, C), lambda bi, s: (bi, s, 0)),
            pl.BlockSpec((C, NC_pad), lambda bi, s: (0, 0)),
            pl.BlockSpec((1, NC_pad), lambda bi, s: (0, 0)),
        ],
        out_specs=pl.BlockSpec((TB, NC_pad), lambda bi, s: (bi, 0)),
        out_shape=jax.ShapeDtypeStruct((N_pad, NC_pad), jnp.float32),
        scratch_shapes=[pltpu.VMEM((TB, C), jnp.float32)],
        compiler_params=pltpu.CompilerParams(
            dimension_semantics=("parallel", "arbitrary")),
    )(x_flat, w_t, bias)
    return out[:N, :num_classes]


# ----------------------------------------------------------------------------
# Full forward (the runnable subset of F2ResNet.forward)
# ----------------------------------------------------------------------------
def f2resnet_forward(x_nchw, params):
    x = jnp.transpose(x_nchw, (0, 2, 3, 1)).astype(jnp.float32)   # NCHW -> NHWC
    x = conv1_bn_relu(x, params["conv1_w"], params["bn1_gamma"],
                      params["bn1_beta"], params["bn1_mean"], params["bn1_var"])
    x = maxpool_3x3_s2_p1(x)
    # TODO(synk): reference res_layer() is not executable PyTorch (missing
    # out_channels argument, undefined FFres_block, nn.Conv2d built inside
    # forward and never applied to a tensor; also `x[0]` before avgpool) ->
    # those four stages are skipped rather than faked.
    return avgpool_fc(x, params["fc_w"], params["fc_b"])


# Pure-JAX reference for the implemented subset (correctness check).
def reference_forward(x_nchw, params, eps=1e-5):
    x = x_nchw.astype(jnp.float32)
    y = jax.lax.conv_general_dilated(
        x, params["conv1_w"], window_strides=(2, 2), padding=((3, 3), (3, 3)),
        dimension_numbers=("NCHW", "OIHW", "NCHW"))
    inv = 1.0 / jnp.sqrt(params["bn1_var"] + eps)
    y = (y - params["bn1_mean"][None, :, None, None]) * \
        (params["bn1_gamma"] * inv)[None, :, None, None] + \
        params["bn1_beta"][None, :, None, None]
    y = jnp.maximum(y, 0.0)
    y = jax.lax.reduce_window(
        y, -jnp.inf, jax.lax.max, (1, 1, 3, 3), (1, 1, 2, 2),
        padding=((0, 0), (0, 0), (1, 1), (1, 1)))
    feat = jnp.mean(y, axis=(2, 3))                               # (N, C)
    return feat @ params["fc_w"].T + params["fc_b"]


if __name__ == "__main__":
    key = jax.random.PRNGKey(0)
    ks = jax.random.split(key, 8)

    N = 2
    in_channels = 32        # model width (reference default 64, small here)
    num_classes = 16        # reference default 1000, small here
    H = Wd = 32

    params = {
        # nn.Conv2d(3, in_channels, 7, stride=2, padding=3, bias=False)
        "conv1_w": 0.05 * jax.random.normal(ks[0], (in_channels, 3, 7, 7), jnp.float32),
        # nn.BatchNorm2d(in_channels) — inference-mode statistics
        "bn1_gamma": 1.0 + 0.1 * jax.random.normal(ks[1], (in_channels,), jnp.float32),
        "bn1_beta": 0.1 * jax.random.normal(ks[2], (in_channels,), jnp.float32),
        "bn1_mean": jnp.zeros((in_channels,), jnp.float32),
        "bn1_var": jnp.ones((in_channels,), jnp.float32),
        # TODO(synk): __init__ declares fc = Linear(in_channels*8, num_classes);
        # with the broken res_layer stages skipped the feature dim is
        # in_channels, so fc is sized (num_classes, in_channels) to match.
        "fc_w": 0.05 * jax.random.normal(ks[3], (num_classes, in_channels), jnp.float32),
        "fc_b": 0.05 * jax.random.normal(ks[4], (num_classes,), jnp.float32),
    }

    x = jax.random.normal(ks[5], (N, 3, H, Wd), jnp.float32)      # NCHW, like PyTorch

    out = jax.block_until_ready(f2resnet_forward(x, params))
    ref = jax.block_until_ready(reference_forward(x, params))

    assert out.shape == (N, num_classes), out.shape
    assert jnp.allclose(out, ref, atol=5e-2, rtol=5e-2), \
        f"max abs err {jnp.max(jnp.abs(out - ref))}"
    print("KERNEL_OK")
</pallas_src>

<mosaic_0001>
module attributes {stable_mosaic.version = 11 : i64} {
  func.func @_conv_bn_relu_kernel(%arg0: i32, %arg1: memref<512x160xbf16, #tpu.memory_space<vmem>>, %arg2: memref<160x128xbf16, #tpu.memory_space<vmem>>, %arg3: memref<1x128xf32, #tpu.memory_space<vmem>>, %arg4: memref<512x128xbf16, #tpu.memory_space<vmem>>) attributes {dimension_semantics = [#tpu.dimension_semantics<parallel>], iteration_bounds = array<i64: 1>, scalar_prefetch = 0 : i64, scratch_operands = 0 : i64, tpu.core_type = #tpu.core_type<tc>, window_params = [{transform_indices = @transform_0, window_bounds = array<i64: 512, 160>}, {pipeline_mode = #tpu.pipeline_mode<synchronous>, transform_indices = @transform_1, window_bounds = array<i64: 160, 128>}, {pipeline_mode = #tpu.pipeline_mode<synchronous>, transform_indices = @transform_2, window_bounds = array<i64: 1, 128>}, {transform_indices = @transform_3, window_bounds = array<i64: 512, 128>}]} {
    %c0 = arith.constant 0 : index
    %c0_0 = arith.constant 0 : index
    %0 = vector.load %arg1[%c0, %c0_0] : memref<512x160xbf16, #tpu.memory_space<vmem>>, vector<512x160xbf16>
    %c0_1 = arith.constant 0 : index
    %c0_2 = arith.constant 0 : index
    %1 = vector.load %arg2[%c0_1, %c0_2] : memref<160x128xbf16, #tpu.memory_space<vmem>>, vector<160x128xbf16>
    %cst = arith.constant dense<0.000000e+00> : vector<512x128xf32>
    %2 = tpu.matmul %0, %1, %cst {dimension_numbers = #tpu.dot_dimension_numbers<[1], [0], [0], [1], [0, 0, 1, 1], [], []>} : vector<512x160xbf16>, vector<160x128xbf16>, vector<512x128xf32> -> vector<512x128xf32>
    %c0_3 = arith.constant 0 : index
    %c0_4 = arith.constant 0 : index
    %3 = vector.load %arg3[%c0_3, %c0_4] : memref<1x128xf32, #tpu.memory_space<vmem>>, vector<1x128xf32>
    %4 = vector.broadcast %3 : vector<1x128xf32> to vector<512x128xf32>
    %5 = arith.addf %2, %4 : vector<512x128xf32>
    %cst_5 = arith.constant 0.000000e+00 : f32
    %6 = vector.broadcast %cst_5 : f32 to vector<512x128xf32>
    %7 = arith.maximumf %5, %6 : vector<512x128xf32>
    %8 = arith.truncf %7 : vector<512x128xf32> to vector<512x128xbf16>
    %c0_6 = arith.constant 0 : index
    %c0_7 = arith.constant 0 : index
    %9 = vector.load %arg4[%c0_6, %c0_7] : memref<512x128xbf16, #tpu.memory_space<vmem>>, vector<512x128xbf16>
    tpu.vector_store %arg4[%c0_6, %c0_7], %8 {strides = array<i32>} : memref<512x128xbf16, #tpu.memory_space<vmem>>, vector<512x128xbf16>,
    return
  }
  func.func @transform_0(%arg0: i32) -> (i32, i32) {
    %c0_i32 = arith.constant 0 : i32
    %c0_i32_0 = arith.constant 0 : i32
    return %arg0, %c0_i32 : i32, i32
  }
  func.func @transform_1(%arg0: i32) -> (i32, i32) {
    %c0_i32 = arith.constant 0 : i32
    %c0_i32_0 = arith.constant 0 : i32
    %c0_i32_1 = arith.constant 0 : i32
    return %c0_i32, %c0_i32_0 : i32, i32
  }
  func.func @transform_2(%arg0: i32) -> (i32, i32) {
    %c0_i32 = arith.constant 0 : i32
    %c0_i32_0 = arith.constant 0 : i32
    %c0_i32_1 = arith.constant 0 : i32
    return %c0_i32, %c0_i32_0 : i32, i32
  }
  func.func @transform_3(%arg0: i32) -> (i32, i32) {
    %c0_i32 = arith.constant 0 : i32
    %c0_i32_0 = arith.constant 0 : i32
    return %arg0, %c0_i32 : i32, i32
  }
}

</mosaic_0001>

<bundles_post_ra>
// kernel: tpu_custom_call.1
= control target key start
LH: loop header
LB: loop body
LE: loop exit
PB: predicated region body
PF: predicated region fallthrough
CT: control target
= control target key end

     0   :  { %v1819_v1 = vmov 0   ;;  %vm455_vm0 = vcmask 261120   ;;  %s2169_s0 = inlined_call_operand.vmem [shape: bf16[512,160], index: 0, kind: input, shape index: {}]   ;;  %s2170_s1 = inlined_call_operand.vmem [shape: bf16[160,128], index: 1, kind: input, shape index: {}]   ;;  %s2171_s2 = inlined_call_operand.vmem [shape: f32[1,128], index: 2, kind: input, shape index: {}]   ;;  %s2172_s3 = inlined_call_operand.hbm [shape: bf16[512,128], index: 3, kind: output, shape index: {}]  }
   0x1   :  { %v1691_v0 = vld [vmem:[%s2170_s1 + $0x38] sm:$0xff]   ;;  %552 = vmatprep.subr.bf16.mxu0 %v1819_v1  ;;  %1667 = vmatprep.subr.bf16.mxu1 %v1819_v1  ;;  %v1692_v2 = vld [vmem:[%s2170_s1 + $0x30] sm:$0xff]   ;;  %v1693_v3 = vld [vmem:[%s2170_s1 + $0x28] sm:$0xff]  }
   0x2   :  { %553 = vmatpush1.bf16.msra.mxu0 %v1691_v0  ;;  %1677 = vmatpush1.bf16.msra.mxu1 %v1691_v0  ;;  %v1694_v4 = vld [vmem:[%s2170_s1 + $0x20] sm:$0xff]   ;;  %v1695_v7 = vld [vmem:[%s2170_s1 + $0x18] sm:$0xff]   ;;  %v1696_v8 = vld [vmem:[%s2170_s1 + $0x10] sm:$0xff]  }
   0x3   :  { %554 = vmatprep.subr.bf16.mxu0 %v1819_v1  ;;  %1668 = vmatprep.subr.bf16.mxu1 %v1819_v1  ;;  %v1703_v5 = vld [vmem:[%s2169_s0 + $0x4] ss:$8 sps:$4 sm:$0xff]   ;;  %v1701_v13 = vld [vmem:[%s2169_s0] ss:$8 sps:$4 sm:$0xff]   ;;  %v1707_v15 = vld [vmem:[%s2169_s0 + $0x14] ss:$8 sps:$4 sm:$0xff]  }
   0x4   :  { %v1706_v6 = vld [vmem:[%s2169_s0 + $0x104] ss:$8 sps:$4 sm:$0xff]   ;;  %1316 = vmatprep.mubr.msk.bf16.mxu0 %vm455_vm0, %v1703_v5  ;;  %v1704_v14 = vld [vmem:[%s2169_s0 + $0x100] ss:$8 sps:$4 sm:$0xff]   ;;  %v1709_v16 = vld [vmem:[%s2169_s0 + $0x114] ss:$8 sps:$4 sm:$0xff]  }
   0x5   :  { %1332 = vmatprep.mubr.msk.bf16.mxu1 %vm455_vm0, %v1706_v6  ;;  %v1697_v9 = vld [vmem:[%s2170_s1 + $0x8] sm:$0xff]   ;;  %v1698_v10 = vld [vmem:[%s2170_s1] sm:$0xff]   ;;  %v1711_v17 = vld [vmem:[%s2169_s0 + $0x10] ss:$8 sps:$4 sm:$0xff]  }
   0x6   :  { %555 = vmatpush1.bf16.msra.mxu0 %v1692_v2  ;;  %1678 = vmatpush1.bf16.msra.mxu1 %v1692_v2  ;;  %v1699_v11 = vld [vmem:[%s2170_s1 + $0x48] sm:$0xff]   ;;  %v1700_v12 = vld [vmem:[%s2170_s1 + $0x40] sm:$0xff]   ;;  %v1712_v18 = vld [vmem:[%s2169_s0 + $0x110] ss:$8 sps:$4 sm:$0xff]  }
   0x7   :  { %556 = vmatprep.subr.bf16.mxu0 %v1819_v1  ;;  %1669 = vmatprep.subr.bf16.mxu1 %v1819_v1  ;;  %v1713_v19 = vld [vmem:[%s2169_s0 + $0x24] ss:$8 sps:$4 sm:$0xff]   ;;  %v1717_v21 = vld [vmem:[%s2169_s0 + $0x20] ss:$8 sps:$4 sm:$0xff]  }
   0x8   :  { %v1715_v20 = vld [vmem:[%s2169_s0 + $0x124] ss:$8 sps:$4 sm:$0xff]   ;;  %v1718_v22 = vld [vmem:[%s2169_s0 + $0x120] ss:$8 sps:$4 sm:$0xff]  }
   0xa   :  { %557 = vmatpush1.bf16.msra.mxu0 %v1693_v3  ;;  %1679 = vmatpush1.bf16.msra.mxu1 %v1693_v3 }
   0xb   :  { %558 = vmatprep.subr.bf16.mxu0 %v1819_v1  ;;  %1670 = vmatprep.subr.bf16.mxu1 %v1819_v1 }
   0xe   :  { %559 = vmatpush1.bf16.msra.mxu0 %v1694_v4  ;;  %1680 = vmatpush1.bf16.msra.mxu1 %v1694_v4 }
   0xf   :  { %560 = vmatprep.subr.bf16.mxu0 %v1819_v1  ;;  %1671 = vmatprep.subr.bf16.mxu1 %v1819_v1 }
  0x12   :  { %561 = vmatpush1.bf16.msra.mxu0 %v1695_v7  ;;  %1681 = vmatpush1.bf16.msra.mxu1 %v1695_v7 }
  0x13   :  { %562 = vmatprep.subr.bf16.mxu0 %v1819_v1  ;;  %1672 = vmatprep.subr.bf16.mxu1 %v1819_v1 }
  0x16   :  { %563 = vmatpush1.bf16.msra.mxu0 %v1696_v8  ;;  %1682 = vmatpush1.bf16.msra.mxu1 %v1696_v8 }
  0x17   :  { %564 = vmatprep.subr.bf16.mxu0 %v1819_v1  ;;  %1673 = vmatprep.subr.bf16.mxu1 %v1819_v1 }
  0x1a   :  { %565 = vmatpush1.bf16.msra.mxu0 %v1697_v9  ;;  %1683 = vmatpush1.bf16.msra.mxu1 %v1697_v9 }
  0x1b   :  { %566 = vmatprep.subr.bf16.mxu0 %v1819_v1  ;;  %1674 = vmatprep.subr.bf16.mxu1 %v1819_v1 }
  0x1e   :  { %567 = vmatpush1.bf16.msra.mxu0 %v1698_v10  ;;  %1684 = vmatpush1.bf16.msra.mxu1 %v1698_v10 }
  0x1f   :  { %580 = vmatprep.subr.bf16.mxu0 %v1819_v1  ;;  %1675 = vmatprep.subr.bf16.mxu1 %v1819_v1 }
  0x22   :  { %581 = vmatpush2.bf16.msra.mxu0 %v1699_v11  ;;  %1685 = vmatpush2.bf16.msra.mxu1 %v1699_v11 }
  0x23   :  { %582 = vmatprep.subr.bf16.mxu0 %v1819_v1  ;;  %1676 = vmatprep.subr.bf16.mxu1 %v1819_v1 }
  0x26   :  { %583 = vmatpush2.bf16.msra.mxu0 %v1700_v12  ;;  %1686 = vmatpush2.bf16.msra.mxu1 %v1700_v12 }
  0x29   :  { %585 = vmatmul.mubr.bf16.vlgmr.msra.gmra.mxu0 %v1701_v13  ;;  %713 = vmatmul.mubr.bf16.vlgmr.msra.gmra.mxu1 %v1704_v14 }
  0x2a   :  { %1317 = vmatprep.mubr.msk.bf16.mxu0 %vm455_vm0, %v1707_v15  ;;  %1333 = vmatprep.mubr.msk.bf16.mxu1 %vm455_vm0, %v1709_v16 }
  0x31   :  { %593 = vmatmul.mubr.bf16.gmra.mxu0 %v1711_v17  ;;  %721 = vmatmul.mubr.bf16.gmra.mxu1 %v1712_v18 }
  0x32   :  { %1318 = vmatprep.mubr.msk.bf16.mxu0 %vm455_vm0, %v1713_v19  ;;  %1334 = vmatprep.mubr.msk.bf16.mxu1 %vm455_vm0, %v1715_v20 }
  0x33   :  { %8 = vsyncpa [#allocation3], 0  ;;  %v1719_v23 = vld [vmem:[%s2169_s0 + $0x34] ss:$8 sps:$4 sm:$0xff]   ;;  %v1723_v25 = vld [vmem:[%s2169_s0 + $0x30] ss:$8 sps:$4 sm:$0xff]  }
  0x34   :  { %v1721_v24 = vld [vmem:[%s2169_s0 + $0x134] ss:$8 sps:$4 sm:$0xff]   ;;  %v1724_v26 = vld [vmem:[%s2169_s0 + $0x130] ss:$8 sps:$4 sm:$0xff]   ;;  %v1725_v27 = vld [vmem:[%s2169_s0 + $0x44] ss:$8 sps:$4 sm:$0xff]  }
  0x35   :  { %v1727_v28 = vld [vmem:[%s2169_s0 + $0x144] ss:$8 sps:$4 sm:$0xff]   ;;  %v1729_v29 = vld [vmem:[%s2169_s0 + $0x40] ss:$8 sps:$4 sm:$0xff]   ;;  %v1731_v31 = vld [vmem:[%s2169_s0 + $0x54] ss:$8 sps:$4 sm:$0xff]  }
  0x36   :  { %v1730_v30 = vld [vmem:[%s2169_s0 + $0x140] ss:$8 sps:$4 sm:$0xff]   ;;  %v1733_v32 = vld [vmem:[%s2169_s0 + $0x154] ss:$8 sps:$4 sm:$0xff]   ;;  %v1735_v33 = vld [vmem:[%s2169_s0 + $0x50] ss:$8 sps:$4 sm:$0xff]  }
  0x37   :  { %v1736_v34 = vld [vmem:[%s2169_s0 + $0x150] ss:$8 sps:$4 sm:$0xff]   ;;  %v1737_v35 = vld [vmem:[%s2169_s0 + $0x64] ss:$8 sps:$4 sm:$0xff]   ;;  %v1741_v37 = vld [vmem:[%s2169_s0 + $0x60] ss:$8 sps:$4 sm:$0xff]  }
  0x38   :  { %v1739_v36 = vld [vmem:[%s2169_s0 + $0x164] ss:$8 sps:$4 sm:$0xff]   ;;  %v1742_v38 = vld [vmem:[%s2169_s0 + $0x160] ss:$8 sps:$4 sm:$0xff]   ;;  %v1743_v39 = vld [vmem:[%s2169_s0 + $0x74] ss:$8 sps:$4 sm:$0xff]  }
  0x39   :  { %601 = vmatmul.mubr.bf16.gmra.mxu0 %v1717_v21  ;;  %729 = vmatmul.mubr.bf16.gmra.mxu1 %v1718_v22  ;;  %v1745_v40 = vld [vmem:[%s2169_s0 + $0x174] ss:$8 sps:$4 sm:$0xff]   ;;  %v1747_v41 = vld [vmem:[%s2169_s0 + $0x70] ss:$8 sps:$4 sm:$0xff]   ;;  %v1749_v43 = vld [vmem:[%s2169_s0 + $0x84] ss:$8 sps:$4 sm:$0xff]  }
  0x3a   :  { %1319 = vmatprep.mubr.msk.bf16.mxu0 %vm455_vm0, %v1719_v23  ;;  %1335 = vmatprep.mubr.msk.bf16.mxu1 %vm455_vm0, %v1721_v24  ;;  %v1748_v42 = vld [vmem:[%s2169_s0 + $0x170] ss:$8 sps:$4 sm:$0xff]   ;;  %v1751_v44 = vld [vmem:[%s2169_s0 + $0x184] ss:$8 sps:$4 sm:$0xff]   ;;  %v1753_v45 = vld [vmem:[%s2169_s0 + $0x80] ss:$8 sps:$4 sm:$0xff]  }
  0x3b   :  { %v1754_v46 = vld [vmem:[%s2169_s0 + $0x180] ss:$8 sps:$4 sm:$0xff]   ;;  %v1755_v47 = vld [vmem:[%s2169_s0 + $0x94] ss:$8 sps:$4 sm:$0xff]   ;;  %v1759_v49 = vld [vmem:[%s2169_s0 + $0x90] ss:$8 sps:$4 sm:$0xff]  }
  0x3c   :  { %v1757_v48 = vld [vmem:[%s2169_s0 + $0x194] ss:$8 sps:$4 sm:$0xff]   ;;  %v1760_v50 = vld [vmem:[%s2169_s0 + $0x190] ss:$8 sps:$4 sm:$0xff]   ;;  %v1761_v51 = vld [vmem:[%s2169_s0 + $0xa4] ss:$8 sps:$4 sm:$0xff]  }
  0x3d   :  { %v1763_v52 = vld [vmem:[%s2169_s0 + $0x1a4] ss:$8 sps:$4 sm:$0xff]   ;;  %v1765_v53 = vld [vmem:[%s2169_s0 + $0xa0] ss:$8 sps:$4 sm:$0xff]   ;;  %v1767_v55 = vld [vmem:[%s2169_s0 + $0xb4] ss:$8 sps:$4 sm:$0xff]  }
  0x3e   :  { %v1766_v54 = vld [vmem:[%s2169_s0 + $0x1a0] ss:$8 sps:$4 sm:$0xff]   ;;  %v1769_v56 = vld [vmem:[%s2169_s0 + $0x1b4] ss:$8 sps:$4 sm:$0xff]   ;;  %v1771_v57 = vld [vmem:[%s2169_s0 + $0xb0] ss:$8 sps:$4 sm:$0xff]  }
  0x3f   :  { %v1772_v58 = vld [vmem:[%s2169_s0 + $0x1b0] ss:$8 sps:$4 sm:$0xff]   ;;  %v1773_v59 = vld [vmem:[%s2169_s0 + $0xc4] ss:$8 sps:$4 sm:$0xff]   ;;  %v1777_v61 = vld [vmem:[%s2169_s0 + $0xc0] ss:$8 sps:$4 sm:$0xff]  }
  0x40   :  { %v1775_v60 = vld [vmem:[%s2169_s0 + $0x1c4] ss:$8 sps:$4 sm:$0xff]   ;;  %v1778_v62 = vld [vmem:[%s2169_s0 + $0x1c0] ss:$8 sps:$4 sm:$0xff]   ;;  %v1779_v63 = vld [vmem:[%s2169_s0 + $0xd4] ss:$8 sps:$4 sm:$0xff]  }
  0x41   :  { %609 = vmatmul.mubr.bf16.gmra.mxu0 %v1723_v25  ;;  %737 = vmatmul.mubr.bf16.gmra.mxu1 %v1724_v26  ;;  %v1781_v0 = vld [vmem:[%s2169_s0 + $0x1d4] ss:$8 sps:$4 sm:$0xff]   ;;  %v1783_v1 = vld [vmem:[%s2169_s0 + $0xd0] ss:$8 sps:$4 sm:$0xff]   ;;  %v1785_v3 = vld [vmem:[%s2169_s0 + $0xe4] ss:$8 sps:$4 sm:$0xff]  }
  0x42   :  { %1320 = vmatprep.mubr.msk.bf16.mxu0 %vm455_vm0, %v1725_v27  ;;  %1336 = vmatprep.mubr.msk.bf16.mxu1 %vm455_vm0, %v1727_v28  ;;  %v1784_v2 = vld [vmem:[%s2169_s0 + $0x1d0] ss:$8 sps:$4 sm:$0xff]   ;;  %v1787_v4 = vld [vmem:[%s2169_s0 + $0x1e4] ss:$8 sps:$4 sm:$0xff]   ;;  %v1789_v5 = vld [vmem:[%s2169_s0 + $0xe0] ss:$8 sps:$4 sm:$0xff]  }
  0x43   :  { %v1790_v6 = vld [vmem:[%s2169_s0 + $0x1e0] ss:$8 sps:$4 sm:$0xff]   ;;  %v1791_v7 = vld [vmem:[%s2169_s0 + $0xf4] ss:$8 sps:$4 sm:$0xff]   ;;  %v1795_v9 = vld [vmem:[%s2169_s0 + $0xf0] ss:$8 sps:$4 sm:$0xff]  }
  0x44   :  { %v1793_v8 = vld [vmem:[%s2169_s0 + $0x1f4] ss:$8 sps:$4 sm:$0xff]   ;;  %v1796_v10 = vld [vmem:[%s2169_s0 + $0x1f0] ss:$8 sps:$4 sm:$0xff]   ;;  %v2100_v11 = vld [vmem:[%s2171_s2] ss:$0 sm:$0xff] }
  0x45   :  { %s1820_s0 = smov [#allocation2]  }
  0x46   :  { %s1230_s2 = sshll.u32 %s1820_s0, 4  ;;  %s1231_s2 = int_to_ptr.vmem [resolvable:$true] %s1230_s2 }
  0x47   :  { %s1797_s22 = scalar_lea.vmem %s1231_s2, 4096  ;;  %p1802_p1 = scmp.lt.s32.totalorder %s1231_s2, %s1231_s2 }
  0x48   :  { %p1798_p0 = scmp.ne.s32.totalorder %s1231_s2, %s1797_s22  ;;  %p1803_p2 = scmp.lt.s32.totalorder %s1797_s22, %s1797_s22 }
  0x49   :  { %617 = vmatmul.mubr.bf16.gmra.mxu0 %v1729_v29  ;;  %745 = vmatmul.mubr.bf16.gmra.mxu1 %v1730_v30 }
  0x4a   :  { %1321 = vmatprep.mubr.msk.bf16.mxu0 %vm455_vm0, %v1731_v31  ;;  %1337 = vmatprep.mubr.msk.bf16.mxu1 %vm455_vm0, %v1733_v32  ;;  %p1804_p3 = por %p1803_p2, %p1802_p1 }
  0x4c   :  { %p1805_p4 = pnand %p1804_p3, %p1798_p0 }
  0x51   :  { %625 = vmatmul.mubr.bf16.gmra.mxu0 %v1735_v33  ;;  %753 = vmatmul.mubr.bf16.gmra.mxu1 %v1736_v34 }
  0x52   :  { %1322 = vmatprep.mubr.msk.bf16.mxu0 %vm455_vm0, %v1737_v35  ;;  %1338 = vmatprep.mubr.msk.bf16.mxu1 %vm455_vm0, %v1739_v36 }
  0x59   :  { %633 = vmatmul.mubr.bf16.gmra.mxu0 %v1741_v37  ;;  %761 = vmatmul.mubr.bf16.gmra.mxu1 %v1742_v38 }
  0x5a   :  { %1323 = vmatprep.mubr.msk.bf16.mxu0 %vm455_vm0, %v1743_v39  ;;  %1339 = vmatprep.mubr.msk.bf16.mxu1 %vm455_vm0, %v1745_v40 }
  0x61   :  { %641 = vmatmul.mubr.bf16.gmra.mxu0 %v1747_v41  ;;  %769 = vmatmul.mubr.bf16.gmra.mxu1 %v1748_v42 }
  0x62   :  { %1324 = vmatprep.mubr.msk.bf16.mxu0 %vm455_vm0, %v1749_v43  ;;  %1340 = vmatprep.mubr.msk.bf16.mxu1 %vm455_vm0, %v1751_v44 }
  0x69   :  { %649 = vmatmul.mubr.bf16.gmra.mxu0 %v1753_v45  ;;  %777 = vmatmul.mubr.bf16.gmra.mxu1 %v1754_v46 }
  0x6a   :  { %1325 = vmatprep.mubr.msk.bf16.mxu0 %vm455_vm0, %v1755_v47  ;;  %1341 = vmatprep.mubr.msk.bf16.mxu1 %vm455_vm0, %v1757_v48 }
  0x71   :  { %657 = vmatmul.mubr.bf16.gmra.mxu0 %v1759_v49  ;;  %785 = vmatmul.mubr.bf16.gmra.mxu1 %v1760_v50 }
  0x72   :  { %1326 = vmatprep.mubr.msk.bf16.mxu0 %vm455_vm0, %v1761_v51  ;;  %1342 = vmatprep.mubr.msk.bf16.mxu1 %vm455_vm0, %v1763_v52 }
  0x79   :  { %665 = vmatmul.mubr.bf16.gmra.mxu0 %v1765_v53  ;;  %793 = vmatmul.mubr.bf16.gmra.mxu1 %v1766_v54 }
  0x7a   :  { %1327 = vmatprep.mubr.msk.bf16.mxu0 %vm455_vm0, %v1767_v55  ;;  %1343 = vmatprep.mubr.msk.bf16.mxu1 %vm455_vm0, %v1769_v56 }
  0x81   :  { %673 = vmatmul.mubr.bf16.gmra.mxu0 %v1771_v57  ;;  %801 = vmatmul.mubr.bf16.gmra.mxu1 %v1772_v58 }
  0x82   :  { %1328 = vmatprep.mubr.msk.bf16.mxu0 %vm455_vm0, %v1773_v59  ;;  %1344 = vmatprep.mubr.msk.bf16.mxu1 %vm455_vm0, %v1775_v60 }
  0x89   :  { %681 = vmatmul.mubr.bf16.gmra.mxu0 %v1777_v61  ;;  %809 = vmatmul.mubr.bf16.gmra.mxu1 %v1778_v62 }
  0x8a   :  { %1329 = vmatprep.mubr.msk.bf16.mxu0 %vm455_vm0, %v1779_v63  ;;  %1345 = vmatprep.mubr.msk.bf16.mxu1 %vm455_vm0, %v1781_v0 }
  0x91   :  { %689 = vmatmul.mubr.bf16.gmra.mxu0 %v1783_v1  ;;  %817 = vmatmul.mubr.bf16.gmra.mxu1 %v1784_v2 }
  0x92   :  { %1330 = vmatprep.mubr.msk.bf16.mxu0 %vm455_vm0, %v1785_v3  ;;  %1346 = vmatprep.mubr.msk.bf16.mxu1 %vm455_vm0, %v1787_v4 }
  0x99   :  { %697 = vmatmul.mubr.bf16.gmra.mxu0 %v1789_v5  ;;  %825 = vmatmul.mubr.bf16.gmra.mxu1 %v1790_v6 }
  0x9a   :  { %1331 = vmatprep.mubr.msk.bf16.mxu0 %vm455_vm0, %v1791_v7  ;;  %1347 = vmatprep.mubr.msk.bf16.mxu1 %vm455_vm0, %v1793_v8 }
  0xa1   :  { %705 = vmatmul.mubr.bf16.gmra.mxu0 %v1795_v9  ;;  %833 = vmatmul.mubr.bf16.gmra.mxu1 %v1796_v10 }
  0xe9   :  { %v586_v12 = vpop.f32.mrf.mxu0  ;;  %v714_v13 = vpop.f32.mrf.mxu1 }
  0xea   :  { %v587_v16 = vadd.f32 %v2100_v11, %v586_v12  ;;  %v715_v17 = vadd.f32 %v2100_v11, %v714_v13 }
  0xeb   :  { %v588_v14 = vpop.f32.mrf.mxu0  ;;  %v716_v15 = vpop.f32.mrf.mxu1 }
  0xec   :  { %v841_v24 = vmax.f32 %v587_v16, 0.0  ;;  %v873_v25 = vmax.f32 %v715_v17, 0.0 }
  0xed   :  { %v589_v18 = vpop.f32.mrf.mxu0  ;;  %v717_v19 = vpop.f32.mrf.mxu1 }
  0xee   :  { %v590_v20 = vadd.f32 %v2100_v11, %v589_v18  ;;  %v718_v21 = vadd.f32 %v2100_v11, %v717_v19 }
  0xef   :  { %v591_v22 = vpop.f32.mrf.mxu0  ;;  %v719_v23 = vpop.f32.mrf.mxu1 }
  0xf0   :  { %v842_v26 = vmax.f32 %v590_v20, 0.0  ;;  %v874_v27 = vmax.f32 %v718_v21, 0.0 }
  0xf1   :  { %v594_v28 = vpop.f32.mrf.mxu0  ;;  %v722_v29 = vpop.f32.mrf.mxu1 }
  0xf2   :  { %v1479_v30 = vpack.c.bf16 %v842_v26, %v841_v24  ;;  %v1559_v31 = vpack.c.bf16 %v874_v27, %v873_v25  ;;  %v595_v34 = vadd.f32 %v2100_v11, %v594_v28  ;;  %v723_v35 = vadd.f32 %v2100_v11, %v722_v29 }
  0xf3   :  { %v596_v32 = vpop.f32.mrf.mxu0  ;;  %v724_v33 = vpop.f32.mrf.mxu1 }
  0xf4   :  { %1480 = vst [vmem:[#allocation2] sm:$0xff] %v1479_v30   ;;  %1651 = vst [vmem:[#allocation2 + $0x80] sm:$0xff] %v1559_v31   ;;  %v843_v42 = vmax.f32 %v595_v34, 0.0  ;;  %v875_v43 = vmax.f32 %v723_v35, 0.0 }
  0xf5   :  { %v597_v36 = vpop.f32.mrf.mxu0  ;;  %v725_v37 = vpop.f32.mrf.mxu1 }
  0xf6   :  { %v598_v38 = vadd.f32 %v2100_v11, %v597_v36  ;;  %v726_v39 = vadd.f32 %v2100_v11, %v725_v37 }
  0xf7   :  { %v599_v40 = vpop.f32.mrf.mxu0  ;;  %v727_v41 = vpop.f32.mrf.mxu1 }
  0xf8   :  { %v844_v44 = vmax.f32 %v598_v38, 0.0  ;;  %v876_v45 = vmax.f32 %v726_v39, 0.0 }
  0xf9   :  { %v602_v46 = vpop.f32.mrf.mxu0  ;;  %v730_v47 = vpop.f32.mrf.mxu1 }
  0xfa   :  { %v1484_v48 = vpack.c.bf16 %v844_v44, %v843_v42  ;;  %v1564_v49 = vpack.c.bf16 %v876_v45, %v875_v43  ;;  %v603_v52 = vadd.f32 %v2100_v11, %v602_v46  ;;  %v731_v53 = vadd.f32 %v2100_v11, %v730_v47 }
  0xfb   :  { %v604_v50 = vpop.f32.mrf.mxu0  ;;  %v732_v51 = vpop.f32.mrf.mxu1 }
  0xfc   :  { %1636 = vst [vmem:[#allocation2 + $0x8] sm:$0xff] %v1484_v48   ;;  %1652 = vst [vmem:[#allocation2 + $0x88] sm:$0xff] %v1564_v49   ;;  %v845_v60 = vmax.f32 %v603_v52, 0.0  ;;  %v877_v61 = vmax.f32 %v731_v53, 0.0 }
  0xfd   :  { %v605_v54 = vpop.f32.mrf.mxu0  ;;  %v733_v55 = vpop.f32.mrf.mxu1 }
  0xfe   :  { %v606_v56 = vadd.f32 %v2100_v11, %v605_v54  ;;  %v734_v57 = vadd.f32 %v2100_v11, %v733_v55 }
  0xff   :  { %v607_v58 = vpop.f32.mrf.mxu0  ;;  %v735_v59 = vpop.f32.mrf.mxu1 }
 0x100   :  { %v846_v62 = vmax.f32 %v606_v56, 0.0  ;;  %v878_v63 = vmax.f32 %v734_v57, 0.0 }
 0x101   :  { %v610_v0 = vpop.f32.mrf.mxu0  ;;  %v738_v1 = vpop.f32.mrf.mxu1 }
 0x102   :  { %v1489_v2 = vpack.c.bf16 %v846_v62, %v845_v60  ;;  %v1569_v3 = vpack.c.bf16 %v878_v63, %v877_v61  ;;  %v611_v6 = vadd.f32 %v2100_v11, %v610_v0  ;;  %v739_v7 = vadd.f32 %v2100_v11, %v738_v1 }
 0x103   :  { %v612_v4 = vpop.f32.mrf.mxu0  ;;  %v740_v5 = vpop.f32.mrf.mxu1 }
 0x104   :  { %1637 = vst [vmem:[#allocation2 + $0x10] sm:$0xff] %v1489_v2   ;;  %1653 = vst [vmem:[#allocation2 + $0x90] sm:$0xff] %v1569_v3   ;;  %v847_v15 = vmax.f32 %v611_v6, 0.0  ;;  %v879_v16 = vmax.f32 %v739_v7, 0.0 }
 0x105   :  { %v613_v8 = vpop.f32.mrf.mxu0  ;;  %v741_v9 = vpop.f32.mrf.mxu1 }
 0x106   :  { %v614_v10 = vadd.f32 %v2100_v11, %v613_v8  ;;  %v742_v12 = vadd.f32 %v2100_v11, %v741_v9 }
 0x107   :  { %v615_v13 = vpop.f32.mrf.mxu0  ;;  %v743_v14 = vpop.f32.mrf.mxu1 }
 0x108   :  { %v848_v17 = vmax.f32 %v614_v10, 0.0  ;;  %v880_v18 = vmax.f32 %v742_v12, 0.0 }
 0x109   :  { %v618_v19 = vpop.f32.mrf.mxu0  ;;  %v746_v20 = vpop.f32.mrf.mxu1 }
 0x10a   :  { %v1494_v21 = vpack.c.bf16 %v848_v17, %v847_v15  ;;  %v1574_v22 = vpack.c.bf16 %v880_v18, %v879_v16  ;;  %v619_v25 = vadd.f32 %v2100_v11, %v618_v19  ;;  %v747_v26 = vadd.f32 %v2100_v11, %v746_v20 }
 0x10b   :  { %v620_v23 = vpop.f32.mrf.mxu0  ;;  %v748_v24 = vpop.f32.mrf.mxu1 }
 0x10c   :  { %1638 = vst [vmem:[#allocation2 + $0x18] sm:$0xff] %v1494_v21   ;;  %1654 = vst [vmem:[#allocation2 + $0x98] sm:$0xff] %v1574_v22   ;;  %v849_v33 = vmax.f32 %v619_v25, 0.0  ;;  %v881_v34 = vmax.f32 %v747_v26, 0.0 }
 0x10d   :  { %v621_v27 = vpop.f32.mrf.mxu0  ;;  %v749_v28 = vpop.f32.mrf.mxu1 }
 0x10e   :  { %v622_v29 = vadd.f32 %v2100_v11, %v621_v27  ;;  %v750_v30 = vadd.f32 %v2100_v11, %v749_v28 }
 0x10f   :  { %v623_v31 = vpop.f32.mrf.mxu0  ;;  %v751_v32 = vpop.f32.mrf.mxu1 }
 0x110   :  { %v850_v35 = vmax.f32 %v622_v29, 0.0  ;;  %v882_v36 = vmax.f32 %v750_v30, 0.0 }
 0x111   :  { %v626_v37 = vpop.f32.mrf.mxu0  ;;  %v754_v38 = vpop.f32.mrf.mxu1 }
 0x112   :  { %v1499_v39 = vpack.c.bf16 %v850_v35, %v849_v33  ;;  %v1579_v40 = vpack.c.bf16 %v882_v36, %v881_v34  ;;  %v627_v43 = vadd.f32 %v2100_v11, %v626_v37  ;;  %v755_v44 = vadd.f32 %v2100_v11, %v754_v38 }
 0x113   :  { %v628_v41 = vpop.f32.mrf.mxu0  ;;  %v756_v42 = vpop.f32.mrf.mxu1 }
 0x114   :  { %1639 = vst [vmem:[#allocation2 + $0x20] sm:$0xff] %v1499_v39   ;;  %1655 = vst [vmem:[#allocation2 + $0xa0] sm:$0xff] %v1579_v40   ;;  %v851_v51 = vmax.f32 %v627_v43, 0.0  ;;  %v883_v52 = vmax.f32 %v755_v44, 0.0 }
 0x115   :  { %v629_v45 = vpop.f32.mrf.mxu0  ;;  %v757_v46 = vpop.f32.mrf.mxu1 }
 0x116   :  { %v630_v47 = vadd.f32 %v2100_v11, %v629_v45  ;;  %v758_v48 = vadd.f32 %v2100_v11, %v757_v46 }
 0x117   :  { %v631_v49 = vpop.f32.mrf.mxu0  ;;  %v759_v50 = vpop.f32.mrf.mxu1 }
 0x118   :  { %v852_v53 = vmax.f32 %v630_v47, 0.0  ;;  %v884_v54 = vmax.f32 %v758_v48, 0.0 }
 0x119   :  { %v634_v55 = vpop.f32.mrf.mxu0  ;;  %v762_v56 = vpop.f32.mrf.mxu1 }
 0x11a   :  { %v1504_v57 = vpack.c.bf16 %v852_v53, %v851_v51  ;;  %v1584_v58 = vpack.c.bf16 %v884_v54, %v883_v52  ;;  %v635_v61 = vadd.f32 %v2100_v11, %v634_v55  ;;  %v763_v62 = vadd.f32 %v2100_v11, %v762_v56 }
 0x11b   :  { %v636_v59 = vpop.f32.mrf.mxu0  ;;  %v764_v60 = vpop.f32.mrf.mxu1 }
 0x11c   :  { %1640 = vst [vmem:[#allocation2 + $0x28] sm:$0xff] %v1504_v57   ;;  %1656 = vst [vmem:[#allocation2 + $0xa8] sm:$0xff] %v1584_v58   ;;  %v853_v5 = vmax.f32 %v635_v61, 0.0  ;;  %v885_v6 = vmax.f32 %v763_v62, 0.0 }
 0x11d   :  { %v637_v63 = vpop.f32.mrf.mxu0  ;;  %v765_v0 = vpop.f32.mrf.mxu1 }
 0x11e   :  { %v638_v1 = vadd.f32 %v2100_v11, %v637_v63  ;;  %v766_v2 = vadd.f32 %v2100_v11, %v765_v0 }
 0x11f   :  { %v639_v3 = vpop.f32.mrf.mxu0  ;;  %v767_v4 = vpop.f32.mrf.mxu1 }
 0x120   :  { %v854_v7 = vmax.f32 %v638_v1, 0.0  ;;  %v886_v8 = vmax.f32 %v766_v2, 0.0 }
 0x121   :  { %v642_v9 = vpop.f32.mrf.mxu0  ;;  %v770_v10 = vpop.f32.mrf.mxu1 }
 0x122   :  { %v1509_v12 = vpack.c.bf16 %v854_v7, %v853_v5  ;;  %v1589_v13 = vpack.c.bf16 %v886_v8, %v885_v6  ;;  %v643_v16 = vadd.f32 %v2100_v11, %v642_v9  ;;  %v771_v17 = vadd.f32 %v2100_v11, %v770_v10 }
 0x123   :  { %v644_v14 = vpop.f32.mrf.mxu0  ;;  %v772_v15 = vpop.f32.mrf.mxu1 }
 0x124   :  { %1641 = vst [vmem:[#allocation2 + $0x30] sm:$0xff] %v1509_v12   ;;  %1657 = vst [vmem:[#allocation2 + $0xb0] sm:$0xff] %v1589_v13   ;;  %v855_v24 = vmax.f32 %v643_v16, 0.0  ;;  %v887_v25 = vmax.f32 %v771_v17, 0.0 }
 0x125   :  { %v645_v18 = vpop.f32.mrf.mxu0  ;;  %v773_v19 = vpop.f32.mrf.mxu1 }
 0x126   :  { %v646_v20 = vadd.f32 %v2100_v11, %v645_v18  ;;  %v774_v21 = vadd.f32 %v2100_v11, %v773_v19 }
 0x127   :  { %v647_v22 = vpop.f32.mrf.mxu0  ;;  %v775_v23 = vpop.f32.mrf.mxu1 }
 0x128   :  { %v856_v26 = vmax.f32 %v646_v20, 0.0  ;;  %v888_v27 = vmax.f32 %v774_v21, 0.0 }
 0x129   :  { %v650_v28 = vpop.f32.mrf.mxu0  ;;  %v778_v29 = vpop.f32.mrf.mxu1 }
 0x12a   :  { %v1514_v30 = vpack.c.bf16 %v856_v26, %v855_v24  ;;  %v1594_v31 = vpack.c.bf16 %v888_v27, %v887_v25  ;;  %v651_v34 = vadd.f32 %v2100_v11, %v650_v28  ;;  %v779_v35 = vadd.f32 %v2100_v11, %v778_v29 }
 0x12b   :  { %v652_v32 = vpop.f32.mrf.mxu0  ;;  %v780_v33 = vpop.f32.mrf.mxu1 }
 0x12c   :  { %1642 = vst [vmem:[#allocation2 + $0x38] sm:$0xff] %v1514_v30   ;;  %1658 = vst [vmem:[#allocation2 + $0xb8] sm:$0xff] %v1594_v31   ;;  %v857_v42 = vmax.f32 %v651_v34, 0.0  ;;  %v889_v43 = vmax.f32 %v779_v35, 0.0 }
 0x12d   :  { %v653_v36 = vpop.f32.mrf.mxu0  ;;  %v781_v37 = vpop.f32.mrf.mxu1 }
 0x12e   :  { %v654_v38 = vadd.f32 %v2100_v11, %v653_v36  ;;  %v782_v39 = vadd.f32 %v2100_v11, %v781_v37 }
 0x12f   :  { %v655_v40 = vpop.f32.mrf.mxu0  ;;  %v783_v41 = vpop.f32.mrf.mxu1 }
 0x130   :  { %v858_v44 = vmax.f32 %v654_v38, 0.0  ;;  %v890_v45 = vmax.f32 %v782_v39, 0.0 }
 0x131   :  { %v658_v46 = vpop.f32.mrf.mxu0  ;;  %v786_v47 = vpop.f32.mrf.mxu1 }
 0x132   :  { %v1519_v48 = vpack.c.bf16 %v858_v44, %v857_v42  ;;  %v1599_v49 = vpack.c.bf16 %v890_v45, %v889_v43  ;;  %v659_v52 = vadd.f32 %v2100_v11, %v658_v46  ;;  %v787_v53 = vadd.f32 %v2100_v11, %v786_v47 }
 0x133   :  { %v660_v50 = vpop.f32.mrf.mxu0  ;;  %v788_v51 = vpop.f32.mrf.mxu1 }
 0x134   :  { %1643 = vst [vmem:[#allocation2 + $0x40] sm:$0xff] %v1519_v48   ;;  %1659 = vst [vmem:[#allocation2 + $0xc0] sm:$0xff] %v1599_v49   ;;  %v859_v60 = vmax.f32 %v659_v52, 0.0  ;;  %v891_v61 = vmax.f32 %v787_v53, 0.0 }
 0x135   :  { %v661_v54 = vpop.f32.mrf.mxu0  ;;  %v789_v55 = vpop.f32.mrf.mxu1 }
 0x136   :  { %v662_v56 = vadd.f32 %v2100_v11, %v661_v54  ;;  %v790_v57 = vadd.f32 %v2100_v11, %v789_v55 }
 0x137   :  { %v663_v58 = vpop.f32.mrf.mxu0  ;;  %v791_v59 = vpop.f32.mrf.mxu1 }
 0x138   :  { %v860_v62 = vmax.f32 %v662_v56, 0.0  ;;  %v892_v63 = vmax.f32 %v790_v57, 0.0 }
 0x139   :  { %v666_v0 = vpop.f32.mrf.mxu0  ;;  %v794_v1 = vpop.f32.mrf.mxu1 }
 0x13a   :  { %v1524_v2 = vpack.c.bf16 %v860_v62, %v859_v60  ;;  %v1604_v3 = vpack.c.bf16 %v892_v63, %v891_v61  ;;  %v667_v6 = vadd.f32 %v2100_v11, %v666_v0  ;;  %v795_v7 = vadd.f32 %v2100_v11, %v794_v1 }
 0x13b   :  { %v668_v4 = vpop.f32.mrf.mxu0  ;;  %v796_v5 = vpop.f32.mrf.mxu1 }
 0x13c   :  { %1644 = vst [vmem:[#allocation2 + $0x48] sm:$0xff] %v1524_v2   ;;  %1660 = vst [vmem:[#allocation2 + $0xc8] sm:$0xff] %v1604_v3   ;;  %v861_v15 = vmax.f32 %v667_v6, 0.0  ;;  %v893_v16 = vmax.f32 %v795_v7, 0.0 }
 0x13d   :  { %v669_v8 = vpop.f32.mrf.mxu0  ;;  %v797_v9 = vpop.f32.mrf.mxu1 }
 0x13e   :  { %v670_v10 = vadd.f32 %v2100_v11, %v669_v8  ;;  %v798_v12 = vadd.f32 %v2100_v11, %v797_v9 }
 0x13f   :  { %v671_v13 = vpop.f32.mrf.mxu0  ;;  %v799_v14 = vpop.f32.mrf.mxu1 }
 0x140   :  { %v862_v17 = vmax.f32 %v670_v10, 0.0  ;;  %v894_v18 = vmax.f32 %v798_v12, 0.0 }
 0x141   :  { %v674_v19 = vpop.f32.mrf.mxu0  ;;  %v802_v20 = vpop.f32.mrf.mxu1 }
 0x142   :  { %v1529_v21 = vpack.c.bf16 %v862_v17, %v861_v15  ;;  %v1609_v22 = vpack.c.bf16 %v894_v18, %v893_v16  ;;  %v675_v25 = vadd.f32 %v2100_v11, %v674_v19  ;;  %v803_v26 = vadd.f32 %v2100_v11, %v802_v20 }
 0x143   :  { %v676_v23 = vpop.f32.mrf.mxu0  ;;  %v804_v24 = vpop.f32.mrf.mxu1 }
 0x144   :  { %1645 = vst [vmem:[#allocation2 + $0x50] sm:$0xff] %v1529_v21   ;;  %1661 = vst [vmem:[#allocation2 + $0xd0] sm:$0xff] %v1609_v22   ;;  %v863_v33 = vmax.f32 %v675_v25, 0.0  ;;  %v895_v34 = vmax.f32 %v803_v26, 0.0 }
 0x145   :  { %v677_v27 = vpop.f32.mrf.mxu0  ;;  %v805_v28 = vpop.f32.mrf.mxu1 }
 0x146   :  { %v678_v29 = vadd.f32 %v2100_v11, %v677_v27  ;;  %v806_v30 = vadd.f32 %v2100_v11, %v805_v28 }
 0x147   :  { %v679_v31 = vpop.f32.mrf.mxu0  ;;  %v807_v32 = vpop.f32.mrf.mxu1 }
 0x148   :  { %v864_v35 = vmax.f32 %v678_v29, 0.0  ;;  %v896_v36 = vmax.f32 %v806_v30, 0.0 }
 0x149   :  { %v682_v37 = vpop.f32.mrf.mxu0  ;;  %v810_v38 = vpop.f32.mrf.mxu1 }
 0x14a   :  { %v1534_v39 = vpack.c.bf16 %v864_v35, %v863_v33  ;;  %v1614_v40 = vpack.c.bf16 %v896_v36, %v895_v34  ;;  %v683_v43 = vadd.f32 %v2100_v11, %v682_v37  ;;  %v811_v44 = vadd.f32 %v2100_v11, %v810_v38 }
 0x14b   :  { %v684_v41 = vpop.f32.mrf.mxu0  ;;  %v812_v42 = vpop.f32.mrf.mxu1 }
 0x14c   :  { %1646 = vst [vmem:[#allocation2 + $0x58] sm:$0xff] %v1534_v39   ;;  %1662 = vst [vmem:[#allocation2 + $0xd8] sm:$0xff] %v1614_v40   ;;  %v865_v51 = vmax.f32 %v683_v43, 0.0  ;;  %v897_v52 = vmax.f32 %v811_v44, 0.0 }
 0x14d   :  { %v685_v45 = vpop.f32.mrf.mxu0  ;;  %v813_v46 = vpop.f32.mrf.mxu1 }
 0x14e   :  { %v686_v47 = vadd.f32 %v2100_v11, %v685_v45  ;;  %v814_v48 = vadd.f32 %v2100_v11, %v813_v46 }
 0x14f   :  { %v687_v49 = vpop.f32.mrf.mxu0  ;;  %v815_v50 = vpop.f32.mrf.mxu1 }
 0x150   :  { %v866_v53 = vmax.f32 %v686_v47, 0.0  ;;  %v898_v54 = vmax.f32 %v814_v48, 0.0 }
 0x151   :  { %v690_v55 = vpop.f32.mrf.mxu0  ;;  %v818_v56 = vpop.f32.mrf.mxu1 }
 0x152   :  { %v1539_v57 = vpack.c.bf16 %v866_v53, %v865_v51  ;;  %v1619_v58 = vpack.c.bf16 %v898_v54, %v897_v52  ;;  %v691_v61 = vadd.f32 %v2100_v11, %v690_v55  ;;  %v819_v62 = vadd.f32 %v2100_v11, %v818_v56 }
 0x153   :  { %v692_v59 = vpop.f32.mrf.mxu0  ;;  %v820_v60 = vpop.f32.mrf.mxu1 }
 0x154   :  { %1647 = vst [vmem:[#allocation2 + $0x60] sm:$0xff] %v1539_v57   ;;  %1663 = vst [vmem:[#allocation2 + $0xe0] sm:$0xff] %v1619_v58   ;;  %v867_v5 = vmax.f32 %v691_v61, 0.0  ;;  %v899_v6 = vmax.f32 %v819_v62, 0.0 }
 0x155   :  { %v693_v63 = vpop.f32.mrf.mxu0  ;;  %v821_v0 = vpop.f32.mrf.mxu1 }
 0x156   :  { %v694_v1 = vadd.f32 %v2100_v11, %v693_v63  ;;  %v822_v2 = vadd.f32 %v2100_v11, %v821_v0 }
 0x157   :  { %v695_v3 = vpop.f32.mrf.mxu0  ;;  %v823_v4 = vpop.f32.mrf.mxu1 }
 0x158   :  { %v868_v7 = vmax.f32 %v694_v1, 0.0  ;;  %v900_v8 = vmax.f32 %v822_v2, 0.0 }
 0x159   :  { %v698_v9 = vpop.f32.mrf.mxu0  ;;  %v826_v10 = vpop.f32.mrf.mxu1 }
 0x15a   :  { %v1544_v12 = vpack.c.bf16 %v868_v7, %v867_v5  ;;  %v1624_v13 = vpack.c.bf16 %v900_v8, %v899_v6  ;;  %v699_v16 = vadd.f32 %v2100_v11, %v698_v9  ;;  %v827_v17 = vadd.f32 %v2100_v11, %v826_v10 }
 0x15b   :  { %v700_v14 = vpop.f32.mrf.mxu0  ;;  %v828_v15 = vpop.f32.mrf.mxu1 }
 0x15c   :  { %1648 = vst [vmem:[#allocation2 + $0x68] sm:$0xff] %v1544_v12   ;;  %1664 = vst [vmem:[#allocation2 + $0xe8] sm:$0xff] %v1624_v13   ;;  %v869_v24 = vmax.f32 %v699_v16, 0.0  ;;  %v901_v25 = vmax.f32 %v827_v17, 0.0 }
 0x15d   :  { %v701_v18 = vpop.f32.mrf.mxu0  ;;  %v829_v19 = vpop.f32.mrf.mxu1 }
 0x15e   :  { %v702_v20 = vadd.f32 %v2100_v11, %v701_v18  ;;  %v830_v21 = vadd.f32 %v2100_v11, %v829_v19 }
 0x15f   :  { %v703_v22 = vpop.f32.mrf.mxu0  ;;  %v831_v23 = vpop.f32.mrf.mxu1 }
 0x160   :  { %v870_v26 = vmax.f32 %v702_v20, 0.0  ;;  %v902_v27 = vmax.f32 %v830_v21, 0.0 }
 0x161   :  { %v706_v28 = vpop.f32.mrf.mxu0  ;;  %v834_v29 = vpop.f32.mrf.mxu1 }
 0x162   :  { %v1549_v30 = vpack.c.bf16 %v870_v26, %v869_v24  ;;  %v1629_v31 = vpack.c.bf16 %v902_v27, %v901_v25  ;;  %v707_v34 = vadd.f32 %v2100_v11, %v706_v28  ;;  %v835_v35 = vadd.f32 %v2100_v11, %v834_v29 }
 0x163   :  { %v708_v32 = vpop.f32.mrf.mxu0  ;;  %v836_v33 = vpop.f32.mrf.mxu1 }
 0x164   :  { %1649 = vst [vmem:[#allocation2 + $0x70] sm:$0xff] %v1549_v30   ;;  %1665 = vst [vmem:[#allocation2 + $0xf0] sm:$0xff] %v1629_v31   ;;  %v871_v42 = vmax.f32 %v707_v34, 0.0  ;;  %v903_v43 = vmax.f32 %v835_v35, 0.0 }
 0x165   :  { %v709_v36 = vpop.f32.mrf.mxu0  ;;  %v837_v37 = vpop.f32.mrf.mxu1 }
 0x166   :  { %v710_v38 = vadd.f32 %v2100_v11, %v709_v36  ;;  %v838_v39 = vadd.f32 %v2100_v11, %v837_v37 }
 0x167   :  { %v711_v40 = vpop.f32.mrf.mxu0  ;;  %v839_v41 = vpop.f32.mrf.mxu1 }
 0x168   :  { %v872_v44 = vmax.f32 %v710_v38, 0.0  ;;  %v904_v45 = vmax.f32 %v838_v39, 0.0 }
 0x16a   :  { %v1554_v46 = vpack.c.bf16 %v872_v44, %v871_v42  ;;  %v1634_v47 = vpack.c.bf16 %v904_v45, %v903_v43 }
 0x16c   :  { %1650 = vst [vmem:[#allocation2 + $0x78] sm:$0xff] %v1554_v46   ;;  %1666 = vst [vmem:[#allocation2 + $0xf8] sm:$0xff] %v1634_v47  }
 0x16d   :  { %1808 = shalt.err (!%p1805_p4)
}
 0x16e   :  { %s1821_s23 = smov 64   ;;  %s1822_s24 = smov 4  }
 0x16f   :  { %1236 = dma.vmem_to_hbm [thread:$0]  %s1231_s2, 4096, %s2172_s3, [#allocation3], %s1821_s23, %s1821_s23, %s1822_s24  }
 0x170   :  { %1817 = dma.done.wait [#allocation3], 4096  }
 0x171   :  { %1818 = vsyncadd [#allocation3], 4294963200 }
 0x172   :  { %1240 = vsyncpa [#allocation3], 1 }

</bundles_post_ra>
